<compile_context>
chip_gen: v5e
topology: v5e:2x2
jax: 0.10.0
libtpu: 0.0.40
codegen_flags: <defaults>
</compile_context>

<pallas_src>
import functools

import jax
import jax.numpy as jnp
from jax.experimental import pallas as pl
from jax.experimental.pallas import tpu as pltpu

EPS = 1e-5  # torch.nn.LayerNorm default


def _round_up(x, m):
    return (x + m - 1) // m * m


def _prenorm_kernel(x_ref, gamma_ref, beta_ref, w_ref, b_ref, o_ref, *, inv_dim):
    # x_ref:     (row_tile, dim_p)  activations, zero-padded lanes
    # gamma_ref: (1, dim_p)         LayerNorm weight (zero in padded lanes)
    # beta_ref:  (1, dim_p)         LayerNorm bias   (zero in padded lanes)
    # w_ref:     (dim_p, tn)        Linear weight slice, bf16, (in, out) layout
    # b_ref:     (1, tn)            Linear bias slice, f32
    # o_ref:     (row_tile, tn)
    x = x_ref[...].astype(jnp.float32)

    # --- LayerNorm over the real `dim`, fused one-pass statistics (f32). ---
    # Padded lanes are zero, so sums over dim_p equal sums over the real dim;
    # dividing by the real dim (inv_dim) gives torch-compatible biased stats.
    s1 = jnp.sum(x, axis=-1, keepdims=True)
    s2 = jnp.sum(x * x, axis=-1, keepdims=True)
    mean = s1 * inv_dim
    var = jnp.maximum(s2 * inv_dim - mean * mean, 0.0)
    inv_std = jax.lax.rsqrt(var + EPS)
    # gamma/beta are zero in padded lanes -> y is exactly zero there.
    y = (x - mean) * inv_std * gamma_ref[...] + beta_ref[...]

    # --- fn: Linear on the MXU, bf16 inputs, f32 accumulation. ---
    out = jnp.dot(y.astype(jnp.bfloat16), w_ref[...],
                  preferred_element_type=jnp.float32) + b_ref[...]

    o_ref[...] = out.astype(o_ref.dtype)


def _pick_row_tile(rows, dtype):
    sub = 16 if dtype == jnp.bfloat16 else 8        # sublane packing
    target = 1024 if dtype == jnp.bfloat16 else 512  # ~85%+ of HBM roofline
    tile = _round_up(rows, sub)
    if tile > sub:
        # Prefer >=2 grid steps so both v7x TensorCores get work.
        tile = max(sub, (tile // 2) // sub * sub)
    return min(target, tile)


def prenorm_apply(x, gamma, beta, w, b):
    """PreNorm(dim, Linear(dim, dim_out)): (batch, seq, dim) -> (batch, seq, dim_out)."""
    batch, seq, dim = x.shape
    dim_out = w.shape[1]
    rows = batch * seq

    # ---- lane-dense padding / tile selection ----
    dim_p = _round_up(dim, 128)
    row_tile = _pick_row_tile(rows, x.dtype)
    rows_p = _round_up(rows, row_tile)
    out_p = _round_up(dim_out, 128)
    tn = out_p if out_p <= 1024 else 512   # N tile keeps W slices VMEM-friendly
    out_p = _round_up(out_p, tn)

    x2 = jnp.pad(x.reshape(rows, dim), ((0, rows_p - rows), (0, dim_p - dim)))
    gamma2 = jnp.pad(gamma.astype(jnp.float32), (0, dim_p - dim)).reshape(1, dim_p)
    beta2 = jnp.pad(beta.astype(jnp.float32), (0, dim_p - dim)).reshape(1, dim_p)
    # Weight stored/streamed in bf16: halves DMA + VMEM, MXU-native input.
    w2 = jnp.pad(w, ((0, dim_p - dim), (0, out_p - dim_out))).astype(jnp.bfloat16)
    b2 = jnp.pad(b.astype(jnp.float32), (0, out_p - dim_out)).reshape(1, out_p)

    grid = (rows_p // row_tile, out_p // tn)
    n_j = grid[1]

    # VMEM budget for the chosen tiles (double-buffered x/out, bf16 W slice).
    vmem_need = (2 * row_tile * dim_p * 4
                 + 2 * row_tile * tn * 4
                 + 2 * dim_p * tn * 2
                 + 4 * dim_p * 4 + 2 * tn * 4)
    vmem_limit = int(min(64 << 20, max(16 << 20, 2 * vmem_need)))

    itemsize = jnp.dtype(x.dtype).itemsize
    cost = pl.CostEstimate(
        flops=int(2 * rows_p * dim_p * out_p + 8 * rows_p * dim_p),
        transcendentals=int(rows_p),
        bytes_accessed=int(rows_p * dim_p * itemsize
                           + dim_p * out_p * 2
                           + rows_p * out_p * itemsize),
    )

    kernel = functools.partial(_prenorm_kernel, inv_dim=1.0 / dim)
    out_shape = jax.ShapeDtypeStruct((rows_p, out_p), x.dtype)
    cparams = pltpu.CompilerParams(
        dimension_semantics=("parallel", "parallel"),
        vmem_limit_bytes=vmem_limit,
    )

    def build(single_buffer):
        def inv_spec(shape, index_map):
            # Grid-invariant operand: no need for a second pipeline buffer.
            if single_buffer:
                return pl.BlockSpec(shape, index_map, pipeline_mode=pl.Buffered(1))
            return pl.BlockSpec(shape, index_map)

        # W / bias are grid-invariant only when there is a single N tile.
        w_spec = inv_spec if (single_buffer and n_j == 1) else pl.BlockSpec
        return pl.pallas_call(
            kernel,
            out_shape=out_shape,
            grid_spec=pltpu.PrefetchScalarGridSpec(
                num_scalar_prefetch=0,
                grid=grid,
                in_specs=[
                    pl.BlockSpec((row_tile, dim_p), lambda i, j: (i, 0)),  # x
                    inv_spec((1, dim_p), lambda i, j: (0, 0)),             # gamma
                    inv_spec((1, dim_p), lambda i, j: (0, 0)),             # beta
                    w_spec((dim_p, tn), lambda i, j: (0, j)),              # W
                    w_spec((1, tn), lambda i, j: (0, j)),                  # bias
                ],
                out_specs=pl.BlockSpec((row_tile, tn), lambda i, j: (i, j)),
            ),
            compiler_params=cparams,
            cost_estimate=cost,
        )

    try:
        out2 = build(True)(x2, gamma2, beta2, w2, b2)
    except Exception:
        # Fallback if this JAX build rejects pl.Buffered(1) single-buffering.
        out2 = build(False)(x2, gamma2, beta2, w2, b2)

    return out2[:rows, :dim_out].reshape(batch, seq, dim_out)


def _reference(x, gamma, beta, w, b):
    xf = x.astype(jnp.float32)
    mean = jnp.mean(xf, axis=-1, keepdims=True)
    var = jnp.mean((xf - mean) ** 2, axis=-1, keepdims=True)
    y = (xf - mean) / jnp.sqrt(var + EPS) * gamma + beta
    return (y @ w + b).astype(x.dtype)


if __name__ == "__main__":
    batch, seq, dim = 2, 8, 32

    key = jax.random.PRNGKey(0)
    kx, kw = jax.random.split(key)

    x = jax.random.normal(kx, (batch, seq, dim), dtype=jnp.float32)

    # Deterministic parameter init (matches module __init__ shapes):
    #   nn.LayerNorm(dim): weight=ones(dim), bias=zeros(dim)
    #   fn = Linear(dim, dim): deterministic random weight, zero bias
    gamma = jnp.ones((dim,), dtype=jnp.float32)
    beta = jnp.zeros((dim,), dtype=jnp.float32)
    w = (jax.random.normal(kw, (dim, dim), dtype=jnp.float32)
         / jnp.sqrt(jnp.float32(dim)))
    b = jnp.zeros((dim,), dtype=jnp.float32)

    out = prenorm_apply(x, gamma, beta, w, b)
    out = jax.block_until_ready(out)

    ref = _reference(x, gamma, beta, w, b)
    assert out.shape == (batch, seq, dim)
    # bf16 MXU inputs => looser tolerance than the previous pure-f32 matmul.
    assert jnp.allclose(out, ref, atol=3e-2, rtol=3e-2), "mismatch vs reference"

    print("KERNEL_OK")
</pallas_src>

<mosaic_0001>
module attributes {stable_mosaic.version = 11 : i64} {
  func.func @_prenorm_kernel(%arg0: i32, %arg1: i32, %arg2: memref<8x128xf32, #tpu.memory_space<vmem>>, %arg3: memref<1x128xf32, #tpu.memory_space<vmem>>, %arg4: memref<1x128xf32, #tpu.memory_space<vmem>>, %arg5: memref<128x128xbf16, #tpu.memory_space<vmem>>, %arg6: memref<1x128xf32, #tpu.memory_space<vmem>>, %arg7: memref<8x128xf32, #tpu.memory_space<vmem>>) attributes {dimension_semantics = [#tpu.dimension_semantics<parallel>, #tpu.dimension_semantics<parallel>], iteration_bounds = array<i64: 2, 1>, scalar_prefetch = 0 : i64, scratch_operands = 0 : i64, tpu.core_type = #tpu.core_type<tc>, window_params = [{transform_indices = @transform_0, window_bounds = array<i64: 8, 128>}, {pipeline_mode = #tpu.pipeline_mode<synchronous>, transform_indices = @transform_1, window_bounds = array<i64: 1, 128>}, {pipeline_mode = #tpu.pipeline_mode<synchronous>, transform_indices = @transform_2, window_bounds = array<i64: 1, 128>}, {pipeline_mode = #tpu.pipeline_mode<synchronous>, transform_indices = @transform_3, window_bounds = array<i64: 128, 128>}, {pipeline_mode = #tpu.pipeline_mode<synchronous>, transform_indices = @transform_4, window_bounds = array<i64: 1, 128>}, {transform_indices = @transform_5, window_bounds = array<i64: 8, 128>}]} {
    %c0 = arith.constant 0 : index
    %c0_0 = arith.constant 0 : index
    %0 = vector.load %arg2[%c0, %c0_0] : memref<8x128xf32, #tpu.memory_space<vmem>>, vector<8x128xf32>
    %cst = arith.constant dense<0.000000e+00> : vector<8xf32>
    %1 = vector.multi_reduction <add>, %0, %cst [1] : vector<8x128xf32> to vector<8xf32>
    %2 = vector.shape_cast %1 : vector<8xf32> to vector<8x1xf32>
    %3 = arith.mulf %0, %0 : vector<8x128xf32>
    %cst_1 = arith.constant dense<0.000000e+00> : vector<8xf32>
    %4 = vector.multi_reduction <add>, %3, %cst_1 [1] : vector<8x128xf32> to vector<8xf32>
    %5 = vector.shape_cast %4 : vector<8xf32> to vector<8x1xf32>
    %cst_2 = arith.constant 3.125000e-02 : f32
    %6 = vector.broadcast %cst_2 : f32 to vector<8x1xf32>
    %7 = arith.mulf %2, %6 : vector<8x1xf32>
    %cst_3 = arith.constant 3.125000e-02 : f32
    %8 = vector.broadcast %cst_3 : f32 to vector<8x1xf32>
    %9 = arith.mulf %5, %8 : vector<8x1xf32>
    %10 = arith.mulf %7, %7 : vector<8x1xf32>
    %11 = arith.subf %9, %10 : vector<8x1xf32>
    %cst_4 = arith.constant 0.000000e+00 : f32
    %12 = vector.broadcast %cst_4 : f32 to vector<8x1xf32>
    %13 = arith.maximumf %11, %12 : vector<8x1xf32>
    %cst_5 = arith.constant 9.99999974E-6 : f32
    %14 = vector.broadcast %cst_5 : f32 to vector<8x1xf32>
    %15 = arith.addf %13, %14 : vector<8x1xf32>
    %16 = math.rsqrt %15 : vector<8x1xf32>
    %17 = vector.broadcast %7 : vector<8x1xf32> to vector<8x128xf32>
    %18 = arith.subf %0, %17 : vector<8x128xf32>
    %19 = vector.broadcast %16 : vector<8x1xf32> to vector<8x128xf32>
    %20 = arith.mulf %18, %19 : vector<8x128xf32>
    %c0_6 = arith.constant 0 : index
    %c0_7 = arith.constant 0 : index
    %21 = vector.load %arg3[%c0_6, %c0_7] : memref<1x128xf32, #tpu.memory_space<vmem>>, vector<1x128xf32>
    %22 = vector.broadcast %21 : vector<1x128xf32> to vector<8x128xf32>
    %23 = arith.mulf %20, %22 : vector<8x128xf32>
    %c0_8 = arith.constant 0 : index
    %c0_9 = arith.constant 0 : index
    %24 = vector.load %arg4[%c0_8, %c0_9] : memref<1x128xf32, #tpu.memory_space<vmem>>, vector<1x128xf32>
    %25 = vector.broadcast %24 : vector<1x128xf32> to vector<8x128xf32>
    %26 = arith.addf %23, %25 : vector<8x128xf32>
    %27 = arith.truncf %26 : vector<8x128xf32> to vector<8x128xbf16>
    %c0_10 = arith.constant 0 : index
    %c0_11 = arith.constant 0 : index
    %28 = vector.load %arg5[%c0_10, %c0_11] : memref<128x128xbf16, #tpu.memory_space<vmem>>, vector<128x128xbf16>
    %cst_12 = arith.constant dense<0.000000e+00> : vector<8x128xf32>
    %29 = tpu.matmul %27, %28, %cst_12 {dimension_numbers = #tpu.dot_dimension_numbers<[1], [0], [0], [1], [0, 0, 1, 1], [], []>} : vector<8x128xbf16>, vector<128x128xbf16>, vector<8x128xf32> -> vector<8x128xf32>
    %c0_13 = arith.constant 0 : index
    %c0_14 = arith.constant 0 : index
    %30 = vector.load %arg6[%c0_13, %c0_14] : memref<1x128xf32, #tpu.memory_space<vmem>>, vector<1x128xf32>
    %31 = vector.broadcast %30 : vector<1x128xf32> to vector<8x128xf32>
    %32 = arith.addf %29, %31 : vector<8x128xf32>
    %c0_15 = arith.constant 0 : index
    %c0_16 = arith.constant 0 : index
    %33 = vector.load %arg7[%c0_15, %c0_16] : memref<8x128xf32, #tpu.memory_space<vmem>>, vector<8x128xf32>
    tpu.vector_store %arg7[%c0_15, %c0_16], %32 {strides = array<i32>} : memref<8x128xf32, #tpu.memory_space<vmem>>, vector<8x128xf32>,
    return
  }
  func.func @transform_0(%arg0: i32, %arg1: i32) -> (i32, i32) {
    %c0_i32 = arith.constant 0 : i32
    %c0_i32_0 = arith.constant 0 : i32
    return %arg0, %c0_i32 : i32, i32
  }
  func.func @transform_1(%arg0: i32, %arg1: i32) -> (i32, i32) {
    %c0_i32 = arith.constant 0 : i32
    %c0_i32_0 = arith.constant 0 : i32
    %c0_i32_1 = arith.constant 0 : i32
    return %c0_i32, %c0_i32_0 : i32, i32
  }
  func.func @transform_2(%arg0: i32, %arg1: i32) -> (i32, i32) {
    %c0_i32 = arith.constant 0 : i32
    %c0_i32_0 = arith.constant 0 : i32
    %c0_i32_1 = arith.constant 0 : i32
    return %c0_i32, %c0_i32_0 : i32, i32
  }
  func.func @transform_3(%arg0: i32, %arg1: i32) -> (i32, i32) {
    %c0_i32 = arith.constant 0 : i32
    %c0_i32_0 = arith.constant 0 : i32
    return %c0_i32, %arg1 : i32, i32
  }
  func.func @transform_4(%arg0: i32, %arg1: i32) -> (i32, i32) {
    %c0_i32 = arith.constant 0 : i32
    %c0_i32_0 = arith.constant 0 : i32
    return %c0_i32, %arg1 : i32, i32
  }
  func.func @transform_5(%arg0: i32, %arg1: i32) -> (i32, i32) {
    %c0_i32 = arith.constant 0 : i32
    return %arg0, %arg1 : i32, i32
  }
}

module attributes {stable_mosaic.version = 11 : i64} {
  func.func @_prenorm_kernel(%arg0: i32, %arg1: i32, %arg2: memref<8x128xf32, #tpu.memory_space<vmem>>, %arg3: memref<1x128xf32, #tpu.memory_space<vmem>>, %arg4: memref<1x128xf32, #tpu.memory_space<vmem>>, %arg5: memref<128x128xbf16, #tpu.memory_space<vmem>>, %arg6: memref<1x128xf32, #tpu.memory_space<vmem>>, %arg7: memref<8x128xf32, #tpu.memory_space<vmem>>) attributes {dimension_semantics = [#tpu.dimension_semantics<parallel>, #tpu.dimension_semantics<parallel>], iteration_bounds = array<i64: 2, 1>, scalar_prefetch = 0 : i64, scratch_operands = 0 : i64, tpu.core_type = #tpu.core_type<tc>, window_params = [{transform_indices = @transform_0, window_bounds = array<i64: 8, 128>}, {pipeline_mode = #tpu.pipeline_mode<synchronous>, transform_indices = @transform_1, window_bounds = array<i64: 1, 128>}, {pipeline_mode = #tpu.pipeline_mode<synchronous>, transform_indices = @transform_2, window_bounds = array<i64: 1, 128>}, {transform_indices = @transform_3, window_bounds = array<i64: 128, 128>}, {transform_indices = @transform_4, window_bounds = array<i64: 1, 128>}, {transform_indices = @transform_5, window_bounds = array<i64: 8, 128>}]} {
    %c0 = arith.constant 0 : index
    %c0_0 = arith.constant 0 : index
    %0 = vector.load %arg2[%c0, %c0_0] : memref<8x128xf32, #tpu.memory_space<vmem>>, vector<8x128xf32>
    %cst = arith.constant dense<0.000000e+00> : vector<8xf32>
    %1 = vector.multi_reduction <add>, %0, %cst [1] : vector<8x128xf32> to vector<8xf32>
    %2 = vector.shape_cast %1 : vector<8xf32> to vector<8x1xf32>
    %3 = arith.mulf %0, %0 : vector<8x128xf32>
    %cst_1 = arith.constant dense<0.000000e+00> : vector<8xf32>
    %4 = vector.multi_reduction <add>, %3, %cst_1 [1] : vector<8x128xf32> to vector<8xf32>
    %5 = vector.shape_cast %4 : vector<8xf32> to vector<8x1xf32>
    %cst_2 = arith.constant 3.125000e-02 : f32
    %6 = vector.broadcast %cst_2 : f32 to vector<8x1xf32>
    %7 = arith.mulf %2, %6 : vector<8x1xf32>
    %cst_3 = arith.constant 3.125000e-02 : f32
    %8 = vector.broadcast %cst_3 : f32 to vector<8x1xf32>
    %9 = arith.mulf %5, %8 : vector<8x1xf32>
    %10 = arith.mulf %7, %7 : vector<8x1xf32>
    %11 = arith.subf %9, %10 : vector<8x1xf32>
    %cst_4 = arith.constant 0.000000e+00 : f32
    %12 = vector.broadcast %cst_4 : f32 to vector<8x1xf32>
    %13 = arith.maximumf %11, %12 : vector<8x1xf32>
    %cst_5 = arith.constant 9.99999974E-6 : f32
    %14 = vector.broadcast %cst_5 : f32 to vector<8x1xf32>
    %15 = arith.addf %13, %14 : vector<8x1xf32>
    %16 = math.rsqrt %15 : vector<8x1xf32>
    %17 = vector.broadcast %7 : vector<8x1xf32> to vector<8x128xf32>
    %18 = arith.subf %0, %17 : vector<8x128xf32>
    %19 = vector.broadcast %16 : vector<8x1xf32> to vector<8x128xf32>
    %20 = arith.mulf %18, %19 : vector<8x128xf32>
    %c0_6 = arith.constant 0 : index
    %c0_7 = arith.constant 0 : index
    %21 = vector.load %arg3[%c0_6, %c0_7] : memref<1x128xf32, #tpu.memory_space<vmem>>, vector<1x128xf32>
    %22 = vector.broadcast %21 : vector<1x128xf32> to vector<8x128xf32>
    %23 = arith.mulf %20, %22 : vector<8x128xf32>
    %c0_8 = arith.constant 0 : index
    %c0_9 = arith.constant 0 : index
    %24 = vector.load %arg4[%c0_8, %c0_9] : memref<1x128xf32, #tpu.memory_space<vmem>>, vector<1x128xf32>
    %25 = vector.broadcast %24 : vector<1x128xf32> to vector<8x128xf32>
    %26 = arith.addf %23, %25 : vector<8x128xf32>
    %27 = arith.truncf %26 : vector<8x128xf32> to vector<8x128xbf16>
    %c0_10 = arith.constant 0 : index
    %c0_11 = arith.constant 0 : index
    %28 = vector.load %arg5[%c0_10, %c0_11] : memref<128x128xbf16, #tpu.memory_space<vmem>>, vector<128x128xbf16>
    %cst_12 = arith.constant dense<0.000000e+00> : vector<8x128xf32>
    %29 = tpu.matmul %27, %28, %cst_12 {dimension_numbers = #tpu.dot_dimension_numbers<[1], [0], [0], [1], [0, 0, 1, 1], [], []>} : vector<8x128xbf16>, vector<128x128xbf16>, vector<8x128xf32> -> vector<8x128xf32>
    %c0_13 = arith.constant 0 : index
    %c0_14 = arith.constant 0 : index
    %30 = vector.load %arg6[%c0_13, %c0_14] : memref<1x128xf32, #tpu.memory_space<vmem>>, vector<1x128xf32>
    %31 = vector.broadcast %30 : vector<1x128xf32> to vector<8x128xf32>
    %32 = arith.addf %29, %31 : vector<8x128xf32>
    %c0_15 = arith.constant 0 : index
    %c0_16 = arith.constant 0 : index
    %33 = vector.load %arg7[%c0_15, %c0_16] : memref<8x128xf32, #tpu.memory_space<vmem>>, vector<8x128xf32>
    tpu.vector_store %arg7[%c0_15, %c0_16], %32 {strides = array<i32>} : memref<8x128xf32, #tpu.memory_space<vmem>>, vector<8x128xf32>,
    return
  }
  func.func @transform_0(%arg0: i32, %arg1: i32) -> (i32, i32) {
    %c0_i32 = arith.constant 0 : i32
    %c0_i32_0 = arith.constant 0 : i32
    return %arg0, %c0_i32 : i32, i32
  }
  func.func @transform_1(%arg0: i32, %arg1: i32) -> (i32, i32) {
    %c0_i32 = arith.constant 0 : i32
    %c0_i32_0 = arith.constant 0 : i32
    %c0_i32_1 = arith.constant 0 : i32
    return %c0_i32, %c0_i32_0 : i32, i32
  }
  func.func @transform_2(%arg0: i32, %arg1: i32) -> (i32, i32) {
    %c0_i32 = arith.constant 0 : i32
    %c0_i32_0 = arith.constant 0 : i32
    %c0_i32_1 = arith.constant 0 : i32
    return %c0_i32, %c0_i32_0 : i32, i32
  }
  func.func @transform_3(%arg0: i32, %arg1: i32) -> (i32, i32) {
    %c0_i32 = arith.constant 0 : i32
    %c0_i32_0 = arith.constant 0 : i32
    return %c0_i32, %arg1 : i32, i32
  }
  func.func @transform_4(%arg0: i32, %arg1: i32) -> (i32, i32) {
    %c0_i32 = arith.constant 0 : i32
    %c0_i32_0 = arith.constant 0 : i32
    return %c0_i32, %arg1 : i32, i32
  }
  func.func @transform_5(%arg0: i32, %arg1: i32) -> (i32, i32) {
    %c0_i32 = arith.constant 0 : i32
    return %arg0, %arg1 : i32, i32
  }
}

</mosaic_0001>

<bundles_post_ra>
// kernel: tpu_custom_call.1
= control target key start
LH: loop header
LB: loop body
LE: loop exit
PB: predicated region body
PF: predicated region fallthrough
CT: control target
= control target key end

     0   :  { %10 = vsyncpa [#allocation3], 0  ;;  %s1070_s0 = inlined_call_operand.hbm [shape: f32[16,128], index: 0, kind: input, shape index: {}]   ;;  %s1071_s1 = inlined_call_operand.hbm [shape: f32[1,128], index: 1, kind: input, shape index: {}]   ;;  %s1072_s2 = inlined_call_operand.vmem [shape: f32[1,128], index: 2, kind: input, shape index: {}]   ;;  %s1073_s3 = inlined_call_operand.hbm [shape: bf16[128,128], index: 3, kind: input, shape index: {}]   ;;  %s1074_s4 = inlined_call_operand.vmem [shape: f32[1,128], index: 4, kind: input, shape index: {}]   ;;  %s1075_s5 = inlined_call_operand.hbm [shape: f32[16,128], index: 5, kind: output, shape index: {}]  }
   0x1   :  { %12 = vsyncpa [#allocation3 + $0x1], 0 }
   0x2   :  { %13 = vsyncpa [#allocation6], 0 }
   0x3   :  { %14 = vsyncpa [#allocation4], 0 }
   0x4   :  { %16 = vsyncpa [#allocation4 + $0x1], 0  ;;  %s914_s18 = smov 0   ;;  %s916_s19 = smov 0  }
   0x5   :  { %s918_s20 = smov 0   ;;  %s920_s21 = smov 0  }
   0x6   :  { %s922_s22 = smov 0   ;;  %s924_s23 = smov 0  }
   0x7 LB: > { %s554_s24 = sadd.s32 4294967295, %s878_s23   ;;  %s555_s25 = sadd.s32 4294967294, %s878_s23   ;;  %s878_s23 = sphi %s924_s23, %s22_s23   ;;  %s874_s22 = sphi %s922_s22, %s1085_s22   ;;  %s870_s21 = sphi %s920_s21, %s1084_s21   ;;  %s866_s20 = sphi %s918_s20, %s1083_s20   ;;  %s862_s19 = sphi %s916_s19, %s1082_s19   ;;  %s858_s18 = sphi %s914_s18, %s1081_s18  }
   0x8   : > { %p54_p0 = scmp.ne.s32.totalorder %s862_s19, %s858_s18  ;;  %p950_p1 = scmp.eq.s32.totalorder %s554_s24, 0 }
   0x9   : > { %p180_p2 = scmp.eq.s32.totalorder %s555_s25, 1  ;;  %p556_p4 = scmp.ge.s32.totalorder %s878_s23, 1 }
   0xa   : > { %p956_p3 = por %p950_p1, %p54_p0  ;;  %p187_p6 = scmp.lt.s32.totalorder %s878_s23, 3 }
   0xb   : > { %p961_p5 = por %p180_p2, %p54_p0  ;;  %s199_s6 = sshll.u32 %s1071_s1, 4  ;;  %s200_s6 = int_to_ptr.hbm [resolvable:$true] %s199_s6 }
   0xc   : > { %p969_p7 = pnand %p556_p4, %p187_p6  ;;  %p560_p8 = scmp.ge.s32.totalorder %s878_s23, 2 }
   0xd   : > { %s880_s8 = smov [#allocation5]   ;;  %s215_s12 = sshll.u32 %s1073_s3, 4  ;;  %s216_s12 = int_to_ptr.hbm [resolvable:$true] %s215_s12 }
   0xe   : > { %p624_p9 = pneg %p969_p7  ;;  %s201_s9 = sshll.u32 %s880_s8, 4  ;;  %s202_s9 = int_to_ptr.vmem [resolvable:$true] %s201_s9 }
   0xf   : > { %s881_s13 = smov [#allocation7]   ;;  %s882_s15 = smov 64  }
  0x10   : > { %p625_p10 = pnand %p624_p9, %p950_p1  ;;  %s217_s14 = sshll.u32 %s881_s13, 4  ;;  %s218_s14 = int_to_ptr.vmem [resolvable:$true] %s217_s14 }
  0x11   : > { %s883_s16 = smov 4   ;;  %p174_p11 = scmp.eq.s32.totalorder %s554_s24, 1 }
  0x12   : > { %627 = dma.hbm_to_vmem [thread:$0]  (!%p625_p10), %s200_s6, 16, %s202_s9, [#allocation6]  }
  0x13   : > { %630 = dma.hbm_to_vmem [thread:$0]  (!%p625_p10), %s216_s12, 1024, %s218_s14, [#allocation6], %s882_s15, %s882_s15, %s883_s16  }
  0x14   : > { %s34_s17 = sadd.s32 1, %s874_s22  ;;  %s41_s25 = sadd.s32 1, %s866_s20 }
  0x15   : > { %p36_p12 = scmp.ge.s32.totalorder %s34_s17, 2  ;;  %p48_p13 = scmp.ne.s32.totalorder %s866_s20, %s862_s19 }
  0x16   : > { %p49_p0 = scmp.eq.s32.totalorder %s878_s23, 0  ;;  %p641_p4 = scmp.lt.s32.totalorder %s878_s23, 2 }
  0x17   : > { %s1087_s17 = smov (%p36_p12, %s34_s17), 0  ;;  %p990_p2 = por %p174_p11, %p48_p13 }
  0x18   : > { %s38_s30 = ssub.s32 %s874_s22, %s1087_s17  ;;  %s237_s6 = sand.u32 1, %s866_s20  }
  0x19   : > { %p39_p6 = scmp.eq.s32.totalorder %s38_s30, 0  ;;  %p50_p9 = por %p49_p0, %p48_p13 }
  0x1a   : > { %s561_s8 = sshll.u32 %s237_s6, 3  ;;  %s562_s24 = sshll.u32 %s874_s22, 3 }
  0x1b   : > { %s1000_s9 = scalar_select %p39_p6, %s866_s20, %s41_s25  }
  0x1c   : > { %s245_s12 = scalar_lea.hbm %s1070_s0, %s562_s24  ;;  %s241_s14 = scalar_lea.vmem [#allocation2], %s561_s8 }
  0x1d   : > { %s247_s13 = sshll.u32 %s245_s12, 4  ;;  %s249_s15 = sshll.u32 %s241_s14, 4  ;;  %s248_s13 = int_to_ptr.hbm [resolvable:$true] %s247_s13  ;;  %s250_s15 = int_to_ptr.vmem [resolvable:$true] %s249_s15 }
  0x1e   : > { %p632_p10 = pnand %p641_p4, %p50_p9  ;;  %s238_s16 = scalar_lea.sflag [#allocation3], %s237_s6 }
  0x1f   : > { %258 = sbr.rel (%p969_p7) target bundleno = 332 (0x14c), region = 40  ;;  %s1010_s25 = sand.u32 (!%p969_p7), 1, %s862_s19  }
  0x20   : > { %634 = dma.hbm_to_vmem [thread:$0]  (!%p632_p10), %s248_s13, 128, %s250_s15, %s238_s16  }
  0x21   : > { %s564_s30 = sshll.u32 (!%p969_p7), %s1010_s25, 3  ;;  %s261_s24 = scalar_lea.sflag (!%p969_p7), [#allocation3], %s1010_s25 }
  0x22   : > { %s264_s8 = scalar_lea.vmem (!%p969_p7), [#allocation2], %s564_s30 }
  0x24   : > { %845 = dma.done.wait (%p956_p3), %s261_s24, 128  }
  0x25   : > { %847 = vsyncadd (%p956_p3), %s261_s24, 4294967168 }
  0x26   : > { %849 = dma.done.wait (%p950_p1), [#allocation6], 1040  }
  0x27   : > { %851 = vsyncadd (%p950_p1), [#allocation6], 4294966256  ;;  %v308_v0 = vld [vmem:[%s264_s8] sm:$0xff]  ;;  %v608_v5 = vld [vmem:[#allocation7 + $0x20] sm:$0xff]  ;;  %s601_s7 = sshll.u32 %s870_s21, 3  ;;  %s304_s14 = scalar_lea.vmem [#allocation8], %s564_s30 }
  0x28   : > { %309 = vadd.xlane.f32.xlu0 %v308_v0  ;;  %v311_v1 = vmul.f32 %v308_v0, %v308_v0  ;;  %v611_v2 = vld [vmem:[#allocation7 + $0x38] sm:$0xff]  ;;  %v610_v3 = vld [vmem:[#allocation7 + $0x30] sm:$0xff]  ;;  %v609_v4 = vld [vmem:[#allocation7 + $0x28] sm:$0xff]  ;;  %s437_s11 = scalar_lea.hbm %s1075_s5, %s601_s7  ;;  %s439_s15 = sshll.u32 %s304_s14, 4  ;;  %s440_s15 = int_to_ptr.vmem [resolvable:$true] %s439_s15 }
  0x29   : > { %411 = vmatpush.bf16.msra.mxu0 %v611_v2  ;;  %v607_v6 = vld [vmem:[#allocation7 + $0x18] sm:$0xff]  ;;  %v606_v7 = vld [vmem:[#allocation7 + $0x10] sm:$0xff]  ;;  %v605_v9 = vld [vmem:[#allocation7 + $0x8] sm:$0xff]  ;;  %s441_s16 = sshll.u32 %s437_s11, 4  ;;  %s426_s24 = scalar_lea.sflag [#allocation4], %s1010_s25  ;;  %s442_s16 = int_to_ptr.hbm [resolvable:$true] %s441_s16 }
  0x2a   : > { %v604_v10 = vld [vmem:[#allocation7] sm:$0xff]  ;;  %v697_v25 = vld [vmem:[#allocation5] ss:$0 sm:$0xff]  ;;  %v698_v28 = vld [vmem:[%s1072_s2] ss:$0 sm:$0xff]  ;;  %s806_s21 = sshra.s32 %s442_s16, 4  ;;  %s807_s21 = int_to_ptr.hbm [resolvable:$true] %s806_s21 }
  0x2b   : > { %v699_v32 = vld [vmem:[%s1074_s4] ss:$0 sm:$0xff]  ;;  %s808_s8 = scalar_lea.hbm %s807_s21, 8  ;;  %s812_s7 = scalar_lea.hbm %s1075_s5, 16 }
  0x2c   : > { %p809_p1 = scmp.ne.s32.totalorder %s807_s21, %s808_s8  ;;  %p813_p11 = scmp.lt.s32.totalorder %s807_s21, %s1075_s5 }
  0x2d   : > { %412 = vmatpush.bf16.msra.mxu0 %v610_v3  ;;  %p814_p12 = scmp.lt.s32.totalorder %s812_s7, %s808_s8 }
  0x2e   : > { %p810_p3 = pnand %p809_p1, %p990_p2 }
  0x2f   : > { %p815_p13 = por %p814_p12, %p813_p11 }
  0x30   : > { %312 = vadd.xlane.f32.xlu0 %v311_v1  ;;  %p811_p7 = pneg %p810_p3 }
  0x31   : > { %413 = vmatpush.bf16.msra.mxu0 %v609_v4 }
  0x32   : > { %p816_p0 = pnand %p815_p13, %p811_p7 }
  0x35   : > { %414 = vmatpush.bf16.msra.mxu0 %v608_v5 }
  0x39   : > { %415 = vmatpush.bf16.msra.mxu0 %v607_v6 }
  0x3d   : > { %416 = vmatpush.bf16.msra.mxu0 %v606_v7 }
  0x41   : > { %417 = vmatpush.bf16.msra.mxu0 %v605_v9 }
  0x45   : > { %418 = vmatpush.bf16.msra.mxu0 %v604_v10 }
  0x9b   : > { %v310_v8 = vpop.xlane.xlu0 %309 }
  0x9c   : > { %v314_v11 = vmul.f32 0.03125, %v310_v8 }
  0x9e   : > { %v316_v13 = vmul.f32 %v314_v11, %v314_v11  ;;  %v330_v24 = vsub.f32 %v308_v0, %v314_v11 }
  0xa3   : > { %v313_v12 = vpop.xlane.xlu0 %312 }
  0xa4   : > { %v315_v14 = vmul.f32 0.03125, %v313_v12 }
  0xa6   : > { %v317_v15 = vsub.f32 %v315_v14, %v316_v13 }
  0xa8   : > { %v318_v16 = vmax.f32 %v317_v15, 0.0 }
  0xaa   : > { %v319_v17 = vadd.f32 1e-05, %v318_v16 }
  0xac   : > { %700 = vrsqrt.f32 %v319_v17  ;;  %vm326_vm1 = vweird.f32 %v319_v17 }
  0xb2   : > { %v701_v18 = vpop.eup %700 }
  0xb3   : > { %v321_v19 = vmul.f32 %v701_v18, %v319_v17  ;;  %vm327_vm0 = vweird.f32 %v701_v18 }
  0xb4   : > { %vm328_vm2 = vmor %vm326_vm1, %vm327_vm0 }
  0xb5   : > { %v322_v20 = vmul.f32 %v701_v18, %v321_v19 }
  0xb7   : > { %v323_v21 = vmul.f32 0.5, %v322_v20 }
  0xb9   : > { %v324_v22 = vsub.f32 1.5, %v323_v21 }
  0xbb   : > { %v325_v23 = vmul.f32 %v701_v18, %v324_v22 }
  0xbd   : > { %v329_v26 = vsel %vm328_vm2, %v701_v18, %v325_v23 }
  0xbe   : > { %v331_v27 = vmul.f32 %v330_v24, %v329_v26 }
  0xc0   : > { %v336_v29 = vmul.f32 %v697_v25, %v331_v27 }
  0xc2   : > { %v341_v30 = vadd.f32 %v698_v28, %v336_v29 }
  0xc4   : > { %v342_v31 = vpack.c.bf16 %v341_v30, %v341_v30 }
  0xc6   : > { %419 = vmatmul.bf16.vlgmr.msra.gmra.mxu0 %v342_v31 }
 0x143   : > { %v420_v33 = vpop.f32.mrf.mxu0 }
 0x144   : > { %v421_v34 = vadd.f32 %v699_v32, %v420_v33 }
 0x146   : > { %424 = vst [vmem:[%s304_s14] sm:$0xff] %v421_v34 }
 0x147   : > { %819 = shalt.err (!%p816_p0)
}
 0x148   : > { %622 = dma.vmem_to_hbm [thread:$0]  (%p990_p2), %s440_s15, 128, %s442_s16, %s426_s24  }
 0x14b   : > { %v422_v35 = vpop.f32.mrf.mxu0 }
 0x14c PF: > { %s453_s25 = sand.u32 1, %s858_s18   ;;  %p636_p4 = pnand %p560_p8, %p961_p5 }
 0x14d   : > { %s454_s10 = scalar_lea.sflag [#allocation4], %s453_s25 }
 0x14e   : > { %p637_p6 = pneg %p636_p4 }
 0x150   : > { %853 = dma.done.wait (%p637_p6), %s454_s10, 128  }
 0x151   : > { %855 = vsyncadd (%p637_p6), %s454_s10, 4294967168  ;;  %s22_s23 = sadd.s32 1, %s878_s23   ;;  %s1081_s18 = smov %s862_s19 }
 0x152   : > { %p19_p9 = scmp.ge.s32.totalorder %s22_s23, 4   ;;  %s1082_s19 = smov %s866_s20 }
 0x153   : > { %s1083_s20 = smov %s1000_s9  ;;  %s1084_s21 = smov %s874_s22 }
 0x154   : > { %s1085_s22 = smov %s1087_s17  ;;  %21 = sbr.rel (!%p19_p9) target bundleno = 7 (0x7), region = 97 }
 0x159   :  { %460 = vsyncpa [#allocation3], 1 }
 0x15a   :  { %462 = vsyncpa [#allocation3 + $0x1], 1 }
 0x15b   :  { %463 = vsyncpa [#allocation6], 1 }
 0x15c   :  { %464 = vsyncpa [#allocation4], 1 }
 0x15d   :  { %466 = vsyncpa [#allocation4 + $0x1], 1 }

// kernel: tpu_custom_call.1
= control target key start
LH: loop header
LB: loop body
LE: loop exit
PB: predicated region body
PF: predicated region fallthrough
CT: control target
= control target key end

     0   :  { %10 = vsyncpa [#allocation3], 0  ;;  %s1070_s0 = inlined_call_operand.hbm [shape: f32[16,128], index: 0, kind: input, shape index: {}]   ;;  %s1071_s1 = inlined_call_operand.hbm [shape: f32[1,128], index: 1, kind: input, shape index: {}]   ;;  %s1072_s2 = inlined_call_operand.vmem [shape: f32[1,128], index: 2, kind: input, shape index: {}]   ;;  %s1073_s3 = inlined_call_operand.hbm [shape: bf16[128,128], index: 3, kind: input, shape index: {}]   ;;  %s1074_s4 = inlined_call_operand.vmem [shape: f32[1,128], index: 4, kind: input, shape index: {}]   ;;  %s1075_s5 = inlined_call_operand.hbm [shape: f32[16,128], index: 5, kind: output, shape index: {}]  }
   0x1   :  { %12 = vsyncpa [#allocation3 + $0x1], 0 }
   0x2   :  { %13 = vsyncpa [#allocation6], 0 }
   0x3   :  { %14 = vsyncpa [#allocation4], 0 }
   0x4   :  { %16 = vsyncpa [#allocation4 + $0x1], 0  ;;  %s914_s18 = smov 0   ;;  %s916_s19 = smov 0  }
   0x5   :  { %s918_s20 = smov 0   ;;  %s920_s21 = smov 0  }
   0x6   :  { %s922_s22 = smov 0   ;;  %s924_s23 = smov 0  }
   0x7 LB: > { %s554_s24 = sadd.s32 4294967295, %s878_s23   ;;  %s555_s25 = sadd.s32 4294967294, %s878_s23   ;;  %s878_s23 = sphi %s924_s23, %s22_s23   ;;  %s874_s22 = sphi %s922_s22, %s1085_s22   ;;  %s870_s21 = sphi %s920_s21, %s1084_s21   ;;  %s866_s20 = sphi %s918_s20, %s1083_s20   ;;  %s862_s19 = sphi %s916_s19, %s1082_s19   ;;  %s858_s18 = sphi %s914_s18, %s1081_s18  }
   0x8   : > { %p54_p0 = scmp.ne.s32.totalorder %s862_s19, %s858_s18  ;;  %p950_p1 = scmp.eq.s32.totalorder %s554_s24, 0 }
   0x9   : > { %p180_p2 = scmp.eq.s32.totalorder %s555_s25, 1  ;;  %p556_p4 = scmp.ge.s32.totalorder %s878_s23, 1 }
   0xa   : > { %p956_p3 = por %p950_p1, %p54_p0  ;;  %p187_p6 = scmp.lt.s32.totalorder %s878_s23, 3 }
   0xb   : > { %p961_p5 = por %p180_p2, %p54_p0  ;;  %s199_s6 = sshll.u32 %s1071_s1, 4  ;;  %s200_s6 = int_to_ptr.hbm [resolvable:$true] %s199_s6 }
   0xc   : > { %p969_p7 = pnand %p556_p4, %p187_p6  ;;  %p560_p8 = scmp.ge.s32.totalorder %s878_s23, 2 }
   0xd   : > { %s880_s8 = smov [#allocation5]   ;;  %s215_s12 = sshll.u32 %s1073_s3, 4  ;;  %s216_s12 = int_to_ptr.hbm [resolvable:$true] %s215_s12 }
   0xe   : > { %p624_p9 = pneg %p969_p7  ;;  %s201_s9 = sshll.u32 %s880_s8, 4  ;;  %s202_s9 = int_to_ptr.vmem [resolvable:$true] %s201_s9 }
   0xf   : > { %s881_s13 = smov [#allocation7]   ;;  %s882_s15 = smov 64  }
  0x10   : > { %p625_p10 = pnand %p624_p9, %p950_p1  ;;  %s217_s14 = sshll.u32 %s881_s13, 4  ;;  %s218_s14 = int_to_ptr.vmem [resolvable:$true] %s217_s14 }
  0x11   : > { %s883_s16 = smov 4   ;;  %p174_p11 = scmp.eq.s32.totalorder %s554_s24, 1 }
  0x12   : > { %627 = dma.hbm_to_vmem [thread:$0]  (!%p625_p10), %s200_s6, 16, %s202_s9, [#allocation6]  }
  0x13   : > { %630 = dma.hbm_to_vmem [thread:$0]  (!%p625_p10), %s216_s12, 1024, %s218_s14, [#allocation6], %s882_s15, %s882_s15, %s883_s16  }
  0x14   : > { %s34_s17 = sadd.s32 1, %s874_s22  ;;  %s41_s25 = sadd.s32 1, %s866_s20 }
  0x15   : > { %p36_p12 = scmp.ge.s32.totalorder %s34_s17, 2  ;;  %p48_p13 = scmp.ne.s32.totalorder %s866_s20, %s862_s19 }
  0x16   : > { %p49_p0 = scmp.eq.s32.totalorder %s878_s23, 0  ;;  %p641_p4 = scmp.lt.s32.totalorder %s878_s23, 2 }
  0x17   : > { %s1087_s17 = smov (%p36_p12, %s34_s17), 0  ;;  %p990_p2 = por %p174_p11, %p48_p13 }
  0x18   : > { %s38_s30 = ssub.s32 %s874_s22, %s1087_s17  ;;  %s237_s6 = sand.u32 1, %s866_s20  }
  0x19   : > { %p39_p6 = scmp.eq.s32.totalorder %s38_s30, 0  ;;  %p50_p9 = por %p49_p0, %p48_p13 }
  0x1a   : > { %s561_s8 = sshll.u32 %s237_s6, 3  ;;  %s562_s24 = sshll.u32 %s874_s22, 3 }
  0x1b   : > { %s1000_s9 = scalar_select %p39_p6, %s866_s20, %s41_s25  }
  0x1c   : > { %s245_s12 = scalar_lea.hbm %s1070_s0, %s562_s24  ;;  %s241_s14 = scalar_lea.vmem [#allocation2], %s561_s8 }
  0x1d   : > { %s247_s13 = sshll.u32 %s245_s12, 4  ;;  %s249_s15 = sshll.u32 %s241_s14, 4  ;;  %s248_s13 = int_to_ptr.hbm [resolvable:$true] %s247_s13  ;;  %s250_s15 = int_to_ptr.vmem [resolvable:$true] %s249_s15 }
  0x1e   : > { %p632_p10 = pnand %p641_p4, %p50_p9  ;;  %s238_s16 = scalar_lea.sflag [#allocation3], %s237_s6 }
  0x1f   : > { %258 = sbr.rel (%p969_p7) target bundleno = 332 (0x14c), region = 40  ;;  %s1010_s25 = sand.u32 (!%p969_p7), 1, %s862_s19  }
  0x20   : > { %634 = dma.hbm_to_vmem [thread:$0]  (!%p632_p10), %s248_s13, 128, %s250_s15, %s238_s16  }
  0x21   : > { %s564_s30 = sshll.u32 (!%p969_p7), %s1010_s25, 3  ;;  %s261_s24 = scalar_lea.sflag (!%p969_p7), [#allocation3], %s1010_s25 }
  0x22   : > { %s264_s8 = scalar_lea.vmem (!%p969_p7), [#allocation2], %s564_s30 }
  0x24   : > { %845 = dma.done.wait (%p956_p3), %s261_s24, 128  }
  0x25   : > { %847 = vsyncadd (%p956_p3), %s261_s24, 4294967168 }
  0x26   : > { %849 = dma.done.wait (%p950_p1), [#allocation6], 1040  }
  0x27   : > { %851 = vsyncadd (%p950_p1), [#allocation6], 4294966256  ;;  %v308_v0 = vld [vmem:[%s264_s8] sm:$0xff]  ;;  %v608_v5 = vld [vmem:[#allocation7 + $0x20] sm:$0xff]  ;;  %s601_s7 = sshll.u32 %s870_s21, 3  ;;  %s304_s14 = scalar_lea.vmem [#allocation8], %s564_s30 }
  0x28   : > { %309 = vadd.xlane.f32.xlu0 %v308_v0  ;;  %v311_v1 = vmul.f32 %v308_v0, %v308_v0  ;;  %v611_v2 = vld [vmem:[#allocation7 + $0x38] sm:$0xff]  ;;  %v610_v3 = vld [vmem:[#allocation7 + $0x30] sm:$0xff]  ;;  %v609_v4 = vld [vmem:[#allocation7 + $0x28] sm:$0xff]  ;;  %s437_s11 = scalar_lea.hbm %s1075_s5, %s601_s7  ;;  %s439_s15 = sshll.u32 %s304_s14, 4  ;;  %s440_s15 = int_to_ptr.vmem [resolvable:$true] %s439_s15 }
  0x29   : > { %411 = vmatpush.bf16.msra.mxu0 %v611_v2  ;;  %v607_v6 = vld [vmem:[#allocation7 + $0x18] sm:$0xff]  ;;  %v606_v7 = vld [vmem:[#allocation7 + $0x10] sm:$0xff]  ;;  %v605_v9 = vld [vmem:[#allocation7 + $0x8] sm:$0xff]  ;;  %s441_s16 = sshll.u32 %s437_s11, 4  ;;  %s426_s24 = scalar_lea.sflag [#allocation4], %s1010_s25  ;;  %s442_s16 = int_to_ptr.hbm [resolvable:$true] %s441_s16 }
  0x2a   : > { %v604_v10 = vld [vmem:[#allocation7] sm:$0xff]  ;;  %v697_v25 = vld [vmem:[#allocation5] ss:$0 sm:$0xff]  ;;  %v698_v28 = vld [vmem:[%s1072_s2] ss:$0 sm:$0xff]  ;;  %s806_s21 = sshra.s32 %s442_s16, 4  ;;  %s807_s21 = int_to_ptr.hbm [resolvable:$true] %s806_s21 }
  0x2b   : > { %v699_v32 = vld [vmem:[%s1074_s4] ss:$0 sm:$0xff]  ;;  %s808_s8 = scalar_lea.hbm %s807_s21, 8  ;;  %s812_s7 = scalar_lea.hbm %s1075_s5, 16 }
  0x2c   : > { %p809_p1 = scmp.ne.s32.totalorder %s807_s21, %s808_s8  ;;  %p813_p11 = scmp.lt.s32.totalorder %s807_s21, %s1075_s5 }
  0x2d   : > { %412 = vmatpush.bf16.msra.mxu0 %v610_v3  ;;  %p814_p12 = scmp.lt.s32.totalorder %s812_s7, %s808_s8 }
  0x2e   : > { %p810_p3 = pnand %p809_p1, %p990_p2 }
  0x2f   : > { %p815_p13 = por %p814_p12, %p813_p11 }
  0x30   : > { %312 = vadd.xlane.f32.xlu0 %v311_v1  ;;  %p811_p7 = pneg %p810_p3 }
  0x31   : > { %413 = vmatpush.bf16.msra.mxu0 %v609_v4 }
  0x32   : > { %p816_p0 = pnand %p815_p13, %p811_p7 }
  0x35   : > { %414 = vmatpush.bf16.msra.mxu0 %v608_v5 }
  0x39   : > { %415 = vmatpush.bf16.msra.mxu0 %v607_v6 }
  0x3d   : > { %416 = vmatpush.bf16.msra.mxu0 %v606_v7 }
  0x41   : > { %417 = vmatpush.bf16.msra.mxu0 %v605_v9 }
  0x45   : > { %418 = vmatpush.bf16.msra.mxu0 %v604_v10 }
  0x9b   : > { %v310_v8 = vpop.xlane.xlu0 %309 }
  0x9c   : > { %v314_v11 = vmul.f32 0.03125, %v310_v8 }
  0x9e   : > { %v316_v13 = vmul.f32 %v314_v11, %v314_v11  ;;  %v330_v24 = vsub.f32 %v308_v0, %v314_v11 }
  0xa3   : > { %v313_v12 = vpop.xlane.xlu0 %312 }
  0xa4   : > { %v315_v14 = vmul.f32 0.03125, %v313_v12 }
  0xa6   : > { %v317_v15 = vsub.f32 %v315_v14, %v316_v13 }
  0xa8   : > { %v318_v16 = vmax.f32 %v317_v15, 0.0 }
  0xaa   : > { %v319_v17 = vadd.f32 1e-05, %v318_v16 }
  0xac   : > { %700 = vrsqrt.f32 %v319_v17  ;;  %vm326_vm1 = vweird.f32 %v319_v17 }
  0xb2   : > { %v701_v18 = vpop.eup %700 }
  0xb3   : > { %v321_v19 = vmul.f32 %v701_v18, %v319_v17  ;;  %vm327_vm0 = vweird.f32 %v701_v18 }
  0xb4   : > { %vm328_vm2 = vmor %vm326_vm1, %vm327_vm0 }
  0xb5   : > { %v322_v20 = vmul.f32 %v701_v18, %v321_v19 }
  0xb7   : > { %v323_v21 = vmul.f32 0.5, %v322_v20 }
  0xb9   : > { %v324_v22 = vsub.f32 1.5, %v323_v21 }
  0xbb   : > { %v325_v23 = vmul.f32 %v701_v18, %v324_v22 }
  0xbd   : > { %v329_v26 = vsel %vm328_vm2, %v701_v18, %v325_v23 }
  0xbe   : > { %v331_v27 = vmul.f32 %v330_v24, %v329_v26 }
  0xc0   : > { %v336_v29 = vmul.f32 %v697_v25, %v331_v27 }
  0xc2   : > { %v341_v30 = vadd.f32 %v698_v28, %v336_v29 }
  0xc4   : > { %v342_v31 = vpack.c.bf16 %v341_v30, %v341_v30 }
  0xc6   : > { %419 = vmatmul.bf16.vlgmr.msra.gmra.mxu0 %v342_v31 }
 0x143   : > { %v420_v33 = vpop.f32.mrf.mxu0 }
 0x144   : > { %v421_v34 = vadd.f32 %v699_v32, %v420_v33 }
 0x146   : > { %424 = vst [vmem:[%s304_s14] sm:$0xff] %v421_v34 }
 0x147   : > { %819 = shalt.err (!%p816_p0)
}
 0x148   : > { %622 = dma.vmem_to_hbm [thread:$0]  (%p990_p2), %s440_s15, 128, %s442_s16, %s426_s24  }
 0x14b   : > { %v422_v35 = vpop.f32.mrf.mxu0 }
 0x14c PF: > { %s453_s25 = sand.u32 1, %s858_s18   ;;  %p636_p4 = pnand %p560_p8, %p961_p5 }
 0x14d   : > { %s454_s10 = scalar_lea.sflag [#allocation4], %s453_s25 }
 0x14e   : > { %p637_p6 = pneg %p636_p4 }
 0x150   : > { %853 = dma.done.wait (%p637_p6), %s454_s10, 128  }
 0x151   : > { %855 = vsyncadd (%p637_p6), %s454_s10, 4294967168  ;;  %s22_s23 = sadd.s32 1, %s878_s23   ;;  %s1081_s18 = smov %s862_s19 }
 0x152   : > { %p19_p9 = scmp.ge.s32.totalorder %s22_s23, 4   ;;  %s1082_s19 = smov %s866_s20 }
 0x153   : > { %s1083_s20 = smov %s1000_s9  ;;  %s1084_s21 = smov %s874_s22 }
 0x154   : > { %s1085_s22 = smov %s1087_s17  ;;  %21 = sbr.rel (!%p19_p9) target bundleno = 7 (0x7), region = 97 }
 0x159   :  { %460 = vsyncpa [#allocation3], 1 }
 0x15a   :  { %462 = vsyncpa [#allocation3 + $0x1], 1 }
 0x15b   :  { %463 = vsyncpa [#allocation6], 1 }
 0x15c   :  { %464 = vsyncpa [#allocation4], 1 }
 0x15d   :  { %466 = vsyncpa [#allocation4 + $0x1], 1 }

</bundles_post_ra>
